<compile_context>
chip_gen: v7x
topology: tpu7x:2x2x1
jax: 0.10.0
libtpu: 0.0.40
codegen_flags: <defaults>
</compile_context>

<pallas_src>
import functools

import jax
import jax.numpy as jnp
from jax import lax
from jax.experimental import pallas as pl
from jax.experimental.pallas import tpu as pltpu

LN_EPS = 1e-5      # PyTorch nn.LayerNorm default
LANE = 128
SUBLANE = 8


def _round_up(x, m):
    return (x + m - 1) // m * m


def _pad2d(a, rows, cols):
    return jnp.pad(a, ((0, rows - a.shape[0]), (0, cols - a.shape[1])))


def _embed_kernel(x_ref, g1_ref, b1_ref, w_ref, bias_ref, g2_ref, b2_ref,
                  cls_ref, o_ref, *, pd_true, d_true, seq_len, valid_rows,
                  matmul_dtype):
    """LN(patch_dim) -> Linear -> LN(D) on one (TM, pd_pad) row tile.

    Rows whose global index is a multiple of seq_len (and < valid_rows) are the
    per-batch cls-token slots; they are overwritten with the raw cls token so
    the kernel emits the final (b, 1+num_patches, D) row layout directly.
    """
    tm = x_ref.shape[0]
    x = x_ref[...].astype(jnp.float32)

    # ---- LayerNorm over patch_dim, single fused pass (2 XLU reductions).
    # Padded feature columns are zero, so sums are exact; divide by true dim.
    inv_pd = 1.0 / pd_true
    mu = jnp.sum(x, axis=-1, keepdims=True) * inv_pd
    ms = jnp.sum(x * x, axis=-1, keepdims=True) * inv_pd
    var = jnp.maximum(ms - mu * mu, 0.0)
    xn = (x - mu) * lax.rsqrt(var + LN_EPS)
    # gamma/beta are zero-padded -> padded columns of xn become exactly 0.
    xn = xn * g1_ref[...].astype(jnp.float32) + b1_ref[...].astype(jnp.float32)

    # ---- Linear on the MXU: bf16 operands, f32 accumulation.
    y = jnp.dot(xn.astype(matmul_dtype), w_ref[...].astype(matmul_dtype),
                preferred_element_type=jnp.float32)
    y = y + bias_ref[...].astype(jnp.float32)

    # ---- LayerNorm over D, same fused single-pass form.
    inv_d = 1.0 / d_true
    mu2 = jnp.sum(y, axis=-1, keepdims=True) * inv_d
    ms2 = jnp.sum(y * y, axis=-1, keepdims=True) * inv_d
    var2 = jnp.maximum(ms2 - mu2 * mu2, 0.0)
    yn = (y - mu2) * lax.rsqrt(var2 + LN_EPS)
    out = yn * g2_ref[...].astype(jnp.float32) + b2_ref[...].astype(jnp.float32)

    # ---- Write the raw cls token into each batch's row 0 (no post-kernel concat).
    row = pl.program_id(0) * tm + lax.broadcasted_iota(jnp.int32, (tm, 1), 0)
    is_cls = (row % seq_len == 0) & (row < valid_rows)
    out = jnp.where(is_cls, cls_ref[...].astype(jnp.float32), out)

    o_ref[...] = out.astype(o_ref.dtype)


def init_params(key, channel, patch_size, D, dtype=jnp.float32):
    patch_dim = channel * patch_size * patch_size
    k_w, k_b, k_cls = jax.random.split(key, 3)
    # nn.Linear default init: U(-1/sqrt(fan_in), 1/sqrt(fan_in))
    bound = 1.0 / jnp.sqrt(patch_dim)
    w = jax.random.uniform(k_w, (patch_dim, D), dtype, -bound, bound)
    bias = jax.random.uniform(k_b, (1, D), dtype, -bound, bound)
    return {
        "ln1_gamma": jnp.ones((1, patch_dim), dtype),
        "ln1_beta": jnp.zeros((1, patch_dim), dtype),
        "w": w,
        "bias": bias,
        "ln2_gamma": jnp.ones((1, D), dtype),
        "ln2_beta": jnp.zeros((1, D), dtype),
        # nn.Parameter(torch.randn(1, 1, D))
        "cls_token": jax.random.normal(k_cls, (1, 1, D), dtype),
    }


def image_embedding(image, params, patch_size, *, block_m=512,
                    out_dtype=None, matmul_dtype=jnp.bfloat16):
    """Forward pass of ImageEmbedding. image: (b, c, H, W) NCHW."""
    b, c, H, W = image.shape
    p = patch_size
    h, w = H // p, W // p
    n = h * w
    patch_dim = c * p * p
    D = params["w"].shape[1]
    out_dtype = image.dtype if out_dtype is None else out_dtype

    # einops: 'b c (h p1) (w p2) -> b (h w) (p1 p2 c)'  (XLA glue)
    patches = image.reshape(b, c, h, p, w, p)
    patches = patches.transpose(0, 2, 4, 3, 5, 1).reshape(b, n, patch_dim)

    # Reserve row 0 of every batch for the cls token: the kernel writes the
    # final (b, 1+n, D) row layout directly (no concatenate afterwards).
    seq_len = 1 + n
    valid_rows = b * seq_len
    patches = jnp.pad(patches, ((0, 0), (1, 0), (0, 0)))
    x2d = patches.reshape(valid_rows, patch_dim)

    # Lane-align feature dims (multiples of 128); tile rows (multiple of 8).
    pd_pad = _round_up(patch_dim, LANE)
    d_pad = _round_up(D, LANE)
    tm = min(block_m, _round_up(valid_rows, SUBLANE))
    m_pad = _round_up(valid_rows, tm)
    x2d = jnp.pad(x2d, ((0, m_pad - valid_rows), (0, pd_pad - patch_dim)))

    g1 = _pad2d(params["ln1_gamma"], 1, pd_pad)
    b1 = _pad2d(params["ln1_beta"], 1, pd_pad)
    w_mat = _pad2d(params["w"], pd_pad, d_pad).astype(matmul_dtype)  # bf16 weight in HBM/VMEM
    bias = _pad2d(params["bias"], 1, d_pad)
    g2 = _pad2d(params["ln2_gamma"], 1, d_pad)
    b2 = _pad2d(params["ln2_beta"], 1, d_pad)
    cls = _pad2d(params["cls_token"].reshape(1, D), 1, d_pad)

    kernel = functools.partial(
        _embed_kernel,
        pd_true=float(patch_dim), d_true=float(D),
        seq_len=seq_len, valid_rows=valid_rows, matmul_dtype=matmul_dtype)

    # VMEM budget: double-buffered x/out tiles + resident weight (+ headroom).
    # Capped at 64 MiB so it is valid on v7x as well as v5e/v6e.
    in_b = x2d.dtype.itemsize
    o_b = jnp.dtype(out_dtype).itemsize
    w_b = w_mat.dtype.itemsize
    est = 2 * tm * (pd_pad * in_b + d_pad * o_b) + 2 * pd_pad * d_pad * w_b
    vmem_limit = int(min(64 * 2 ** 20, max(2 * est, 32 * 2 ** 20)))

    out2d = pl.pallas_call(
        kernel,
        out_shape=jax.ShapeDtypeStruct((m_pad, d_pad), out_dtype),
        grid_spec=pltpu.PrefetchScalarGridSpec(
            num_scalar_prefetch=0,
            grid=(m_pad // tm,),
            in_specs=[
                pl.BlockSpec((tm, pd_pad), lambda i: (i, 0)),      # x row tile (pipelined)
                pl.BlockSpec((1, pd_pad), lambda i: (0, 0)),       # ln1 gamma (resident)
                pl.BlockSpec((1, pd_pad), lambda i: (0, 0)),       # ln1 beta
                pl.BlockSpec((pd_pad, d_pad), lambda i: (0, 0)),   # weight (resident)
                pl.BlockSpec((1, d_pad), lambda i: (0, 0)),        # bias
                pl.BlockSpec((1, d_pad), lambda i: (0, 0)),        # ln2 gamma
                pl.BlockSpec((1, d_pad), lambda i: (0, 0)),        # ln2 beta
                pl.BlockSpec((1, d_pad), lambda i: (0, 0)),        # cls token
            ],
            out_specs=pl.BlockSpec((tm, d_pad), lambda i: (i, 0)),
        ),
        compiler_params=pltpu.CompilerParams(
            dimension_semantics=("parallel",),   # shard row tiles across v7x's 2 TCs
            vmem_limit_bytes=vmem_limit,
        ),
    )(x2d, g1, b1, w_mat, bias, g2, b2, cls)

    # Drop row/lane padding and restore (b, 1+n, D).
    return out2d[:valid_rows, :D].reshape(b, seq_len, D)


def _reference(image, params, patch_size, matmul_dtype=jnp.bfloat16):
    """Pure-JAX reference matching the PyTorch module (bf16 matmul like the kernel)."""
    b, c, H, W = image.shape
    p = patch_size
    h, w = H // p, W // p
    patch_dim = c * p * p
    D = params["w"].shape[1]
    x = image.reshape(b, c, h, p, w, p).transpose(0, 2, 4, 3, 5, 1)
    x = x.reshape(b, h * w, patch_dim).astype(jnp.float32)
    mu = x.mean(-1, keepdims=True)
    var = ((x - mu) ** 2).mean(-1, keepdims=True)
    xn = (x - mu) / jnp.sqrt(var + LN_EPS)
    xn = xn * params["ln1_gamma"] + params["ln1_beta"]
    y = jnp.einsum("bnk,kd->bnd", xn.astype(matmul_dtype),
                   params["w"].astype(matmul_dtype),
                   preferred_element_type=jnp.float32) + params["bias"]
    mu2 = y.mean(-1, keepdims=True)
    var2 = ((y - mu2) ** 2).mean(-1, keepdims=True)
    yn = (y - mu2) / jnp.sqrt(var2 + LN_EPS)
    emb = yn * params["ln2_gamma"] + params["ln2_beta"]
    cls = jnp.broadcast_to(params["cls_token"], (b, 1, D)).astype(jnp.float32)
    return jnp.concatenate([cls, emb], axis=1)


if __name__ == "__main__":
    # Small shapes consistent with the module: b=2, c=4, 16x16 image, patch=4, D=32
    b, c, Hs, Ws = 2, 4, 16, 16
    patch_size, D = 4, 32

    key = jax.random.PRNGKey(0)
    k_img, k_par = jax.random.split(key)
    image = jax.random.normal(k_img, (b, c, Hs, Ws), jnp.float32)
    params = init_params(k_par, c, patch_size, D)

    fwd = jax.jit(functools.partial(image_embedding, patch_size=patch_size))
    out = jax.block_until_ready(fwd(image, params))

    n_patches = (Hs // patch_size) * (Ws // patch_size)
    assert out.shape == (b, 1 + n_patches, D), out.shape

    ref = _reference(image, params, patch_size)
    max_err = float(jnp.max(jnp.abs(out.astype(jnp.float32) - ref)))
    assert max_err < 2e-2, f"max abs error {max_err}"

    print("KERNEL_OK")
</pallas_src>

<mosaic_0001>
module attributes {stable_mosaic.version = 11 : i64} {
  func.func @_embed_kernel(%arg0: i32, %arg1: memref<40x128xf32, #tpu.memory_space<vmem>>, %arg2: memref<1x128xf32, #tpu.memory_space<vmem>>, %arg3: memref<1x128xf32, #tpu.memory_space<vmem>>, %arg4: memref<128x128xbf16, #tpu.memory_space<vmem>>, %arg5: memref<1x128xf32, #tpu.memory_space<vmem>>, %arg6: memref<1x128xf32, #tpu.memory_space<vmem>>, %arg7: memref<1x128xf32, #tpu.memory_space<vmem>>, %arg8: memref<1x128xf32, #tpu.memory_space<vmem>>, %arg9: memref<40x128xf32, #tpu.memory_space<vmem>>) attributes {dimension_semantics = [#tpu.dimension_semantics<parallel>], iteration_bounds = array<i64: 1>, scalar_prefetch = 0 : i64, scratch_operands = 0 : i64, tpu.core_type = #tpu.core_type<tc>, window_params = [{transform_indices = @transform_0, window_bounds = array<i64: 40, 128>}, {pipeline_mode = #tpu.pipeline_mode<synchronous>, transform_indices = @transform_1, window_bounds = array<i64: 1, 128>}, {pipeline_mode = #tpu.pipeline_mode<synchronous>, transform_indices = @transform_2, window_bounds = array<i64: 1, 128>}, {pipeline_mode = #tpu.pipeline_mode<synchronous>, transform_indices = @transform_3, window_bounds = array<i64: 128, 128>}, {pipeline_mode = #tpu.pipeline_mode<synchronous>, transform_indices = @transform_4, window_bounds = array<i64: 1, 128>}, {pipeline_mode = #tpu.pipeline_mode<synchronous>, transform_indices = @transform_5, window_bounds = array<i64: 1, 128>}, {pipeline_mode = #tpu.pipeline_mode<synchronous>, transform_indices = @transform_6, window_bounds = array<i64: 1, 128>}, {pipeline_mode = #tpu.pipeline_mode<synchronous>, transform_indices = @transform_7, window_bounds = array<i64: 1, 128>}, {transform_indices = @transform_8, window_bounds = array<i64: 40, 128>}]} {
    %c0 = arith.constant 0 : index
    %c0_0 = arith.constant 0 : index
    %0 = vector.load %arg1[%c0, %c0_0] : memref<40x128xf32, #tpu.memory_space<vmem>>, vector<40x128xf32>
    %cst = arith.constant dense<0.000000e+00> : vector<40xf32>
    %1 = vector.multi_reduction <add>, %0, %cst [1] : vector<40x128xf32> to vector<40xf32>
    %2 = vector.shape_cast %1 : vector<40xf32> to vector<40x1xf32>
    %cst_1 = arith.constant 1.562500e-02 : f32
    %3 = vector.broadcast %cst_1 : f32 to vector<40x1xf32>
    %4 = arith.mulf %2, %3 : vector<40x1xf32>
    %5 = arith.mulf %0, %0 : vector<40x128xf32>
    %cst_2 = arith.constant dense<0.000000e+00> : vector<40xf32>
    %6 = vector.multi_reduction <add>, %5, %cst_2 [1] : vector<40x128xf32> to vector<40xf32>
    %7 = vector.shape_cast %6 : vector<40xf32> to vector<40x1xf32>
    %cst_3 = arith.constant 1.562500e-02 : f32
    %8 = vector.broadcast %cst_3 : f32 to vector<40x1xf32>
    %9 = arith.mulf %7, %8 : vector<40x1xf32>
    %10 = arith.mulf %4, %4 : vector<40x1xf32>
    %11 = arith.subf %9, %10 : vector<40x1xf32>
    %cst_4 = arith.constant 0.000000e+00 : f32
    %12 = vector.broadcast %cst_4 : f32 to vector<40x1xf32>
    %13 = arith.maximumf %11, %12 : vector<40x1xf32>
    %14 = vector.broadcast %4 : vector<40x1xf32> to vector<40x128xf32>
    %15 = arith.subf %0, %14 : vector<40x128xf32>
    %cst_5 = arith.constant 9.99999974E-6 : f32
    %16 = vector.broadcast %cst_5 : f32 to vector<40x1xf32>
    %17 = arith.addf %13, %16 : vector<40x1xf32>
    %18 = math.rsqrt %17 : vector<40x1xf32>
    %19 = vector.broadcast %18 : vector<40x1xf32> to vector<40x128xf32>
    %20 = arith.mulf %15, %19 : vector<40x128xf32>
    %c0_6 = arith.constant 0 : index
    %c0_7 = arith.constant 0 : index
    %21 = vector.load %arg2[%c0_6, %c0_7] : memref<1x128xf32, #tpu.memory_space<vmem>>, vector<1x128xf32>
    %22 = vector.broadcast %21 : vector<1x128xf32> to vector<40x128xf32>
    %23 = arith.mulf %20, %22 : vector<40x128xf32>
    %c0_8 = arith.constant 0 : index
    %c0_9 = arith.constant 0 : index
    %24 = vector.load %arg3[%c0_8, %c0_9] : memref<1x128xf32, #tpu.memory_space<vmem>>, vector<1x128xf32>
    %25 = vector.broadcast %24 : vector<1x128xf32> to vector<40x128xf32>
    %26 = arith.addf %23, %25 : vector<40x128xf32>
    %27 = arith.truncf %26 : vector<40x128xf32> to vector<40x128xbf16>
    %c0_10 = arith.constant 0 : index
    %c0_11 = arith.constant 0 : index
    %28 = vector.load %arg4[%c0_10, %c0_11] : memref<128x128xbf16, #tpu.memory_space<vmem>>, vector<128x128xbf16>
    %cst_12 = arith.constant dense<0.000000e+00> : vector<40x128xf32>
    %29 = tpu.matmul %27, %28, %cst_12 {dimension_numbers = #tpu.dot_dimension_numbers<[1], [0], [0], [1], [0, 0, 1, 1], [], []>} : vector<40x128xbf16>, vector<128x128xbf16>, vector<40x128xf32> -> vector<40x128xf32>
    %c0_13 = arith.constant 0 : index
    %c0_14 = arith.constant 0 : index
    %30 = vector.load %arg5[%c0_13, %c0_14] : memref<1x128xf32, #tpu.memory_space<vmem>>, vector<1x128xf32>
    %31 = vector.broadcast %30 : vector<1x128xf32> to vector<40x128xf32>
    %32 = arith.addf %29, %31 : vector<40x128xf32>
    %cst_15 = arith.constant dense<0.000000e+00> : vector<40xf32>
    %33 = vector.multi_reduction <add>, %32, %cst_15 [1] : vector<40x128xf32> to vector<40xf32>
    %34 = vector.shape_cast %33 : vector<40xf32> to vector<40x1xf32>
    %cst_16 = arith.constant 3.125000e-02 : f32
    %35 = vector.broadcast %cst_16 : f32 to vector<40x1xf32>
    %36 = arith.mulf %34, %35 : vector<40x1xf32>
    %37 = arith.mulf %32, %32 : vector<40x128xf32>
    %cst_17 = arith.constant dense<0.000000e+00> : vector<40xf32>
    %38 = vector.multi_reduction <add>, %37, %cst_17 [1] : vector<40x128xf32> to vector<40xf32>
    %39 = vector.shape_cast %38 : vector<40xf32> to vector<40x1xf32>
    %cst_18 = arith.constant 3.125000e-02 : f32
    %40 = vector.broadcast %cst_18 : f32 to vector<40x1xf32>
    %41 = arith.mulf %39, %40 : vector<40x1xf32>
    %42 = arith.mulf %36, %36 : vector<40x1xf32>
    %43 = arith.subf %41, %42 : vector<40x1xf32>
    %cst_19 = arith.constant 0.000000e+00 : f32
    %44 = vector.broadcast %cst_19 : f32 to vector<40x1xf32>
    %45 = arith.maximumf %43, %44 : vector<40x1xf32>
    %46 = vector.broadcast %36 : vector<40x1xf32> to vector<40x128xf32>
    %47 = arith.subf %32, %46 : vector<40x128xf32>
    %cst_20 = arith.constant 9.99999974E-6 : f32
    %48 = vector.broadcast %cst_20 : f32 to vector<40x1xf32>
    %49 = arith.addf %45, %48 : vector<40x1xf32>
    %50 = math.rsqrt %49 : vector<40x1xf32>
    %51 = vector.broadcast %50 : vector<40x1xf32> to vector<40x128xf32>
    %52 = arith.mulf %47, %51 : vector<40x128xf32>
    %c0_21 = arith.constant 0 : index
    %c0_22 = arith.constant 0 : index
    %53 = vector.load %arg6[%c0_21, %c0_22] : memref<1x128xf32, #tpu.memory_space<vmem>>, vector<1x128xf32>
    %54 = vector.broadcast %53 : vector<1x128xf32> to vector<40x128xf32>
    %55 = arith.mulf %52, %54 : vector<40x128xf32>
    %c0_23 = arith.constant 0 : index
    %c0_24 = arith.constant 0 : index
    %56 = vector.load %arg7[%c0_23, %c0_24] : memref<1x128xf32, #tpu.memory_space<vmem>>, vector<1x128xf32>
    %57 = vector.broadcast %56 : vector<1x128xf32> to vector<40x128xf32>
    %58 = arith.addf %55, %57 : vector<40x128xf32>
    %c40_i32 = arith.constant 40 : i32
    %59 = arith.muli %arg0, %c40_i32 : i32
    %60 = tpu.iota {dimensions = array<i32: 0>} : vector<40x1xi32>
    %61 = vector.broadcast %59 : i32 to vector<40x1xi32>
    %62 = arith.addi %61, %60 : vector<40x1xi32>
    %c17_i32 = arith.constant 17 : i32
    %c0_i32 = arith.constant 0 : i32
    %63 = arith.cmpi eq, %c17_i32, %c0_i32 : i32
    %c1_i32 = arith.constant 1 : i32
    %64 = arith.select %63, %c1_i32, %c17_i32 : i32
    %65 = vector.broadcast %64 : i32 to vector<40x1xi32>
    %66 = arith.remsi %62, %65 : vector<40x1xi32>
    %c0_i32_25 = arith.constant 0 : i32
    %67 = vector.broadcast %c0_i32_25 : i32 to vector<40x1xi32>
    %68 = arith.cmpi ne, %66, %67 : vector<40x1xi32>
    %c0_i32_26 = arith.constant 0 : i32
    %69 = vector.broadcast %c0_i32_26 : i32 to vector<40x1xi32>
    %70 = arith.cmpi slt, %66, %69 : vector<40x1xi32>
    %c0_i32_27 = arith.constant 0 : i32
    %71 = arith.cmpi slt, %64, %c0_i32_27 : i32
    %72 = vector.broadcast %71 : i1 to vector<40x1xi1>
    %73 = vector.broadcast %72 : vector<40x1xi1> to vector<40x1xi1>
    %74 = arith.xori %70, %73 : vector<40x1xi1>
    %75 = arith.andi %74, %68 : vector<40x1xi1>
    %76 = vector.broadcast %64 : i32 to vector<40x1xi32>
    %77 = arith.addi %66, %76 : vector<40x1xi32>
    %78 = arith.select %75, %77, %66 : vector<40x1xi1>, vector<40x1xi32>
    %c0_i32_28 = arith.constant 0 : i32
    %79 = vector.broadcast %c0_i32_28 : i32 to vector<40x1xi32>
    %80 = arith.cmpi eq, %78, %79 : vector<40x1xi32>
    %c34_i32 = arith.constant 34 : i32
    %81 = vector.broadcast %c34_i32 : i32 to vector<40x1xi32>
    %82 = arith.cmpi slt, %62, %81 : vector<40x1xi32>
    %83 = arith.andi %80, %82 : vector<40x1xi1>
    %c0_29 = arith.constant 0 : index
    %c0_30 = arith.constant 0 : index
    %84 = vector.load %arg8[%c0_29, %c0_30] : memref<1x128xf32, #tpu.memory_space<vmem>>, vector<1x128xf32>
    %85 = vector.shape_cast %83 : vector<40x1xi1> to vector<40x1xi1>
    %86 = vector.broadcast %85 : vector<40x1xi1> to vector<40x128xi1>
    %87 = vector.shape_cast %84 : vector<1x128xf32> to vector<1x128xf32>
    %88 = vector.broadcast %87 : vector<1x128xf32> to vector<40x128xf32>
    %89 = arith.select %86, %88, %58 : vector<40x128xi1>, vector<40x128xf32>
    %c0_31 = arith.constant 0 : index
    %c0_32 = arith.constant 0 : index
    %90 = vector.load %arg9[%c0_31, %c0_32] : memref<40x128xf32, #tpu.memory_space<vmem>>, vector<40x128xf32>
    tpu.vector_store %arg9[%c0_31, %c0_32], %89 {strides = array<i32>} : memref<40x128xf32, #tpu.memory_space<vmem>>, vector<40x128xf32>,
    return
  }
  func.func @transform_0(%arg0: i32) -> (i32, i32) {
    %c0_i32 = arith.constant 0 : i32
    %c0_i32_0 = arith.constant 0 : i32
    return %arg0, %c0_i32 : i32, i32
  }
  func.func @transform_1(%arg0: i32) -> (i32, i32) {
    %c0_i32 = arith.constant 0 : i32
    %c0_i32_0 = arith.constant 0 : i32
    %c0_i32_1 = arith.constant 0 : i32
    return %c0_i32, %c0_i32_0 : i32, i32
  }
  func.func @transform_2(%arg0: i32) -> (i32, i32) {
    %c0_i32 = arith.constant 0 : i32
    %c0_i32_0 = arith.constant 0 : i32
    %c0_i32_1 = arith.constant 0 : i32
    return %c0_i32, %c0_i32_0 : i32, i32
  }
  func.func @transform_3(%arg0: i32) -> (i32, i32) {
    %c0_i32 = arith.constant 0 : i32
    %c0_i32_0 = arith.constant 0 : i32
    %c0_i32_1 = arith.constant 0 : i32
    return %c0_i32, %c0_i32_0 : i32, i32
  }
  func.func @transform_4(%arg0: i32) -> (i32, i32) {
    %c0_i32 = arith.constant 0 : i32
    %c0_i32_0 = arith.constant 0 : i32
    %c0_i32_1 = arith.constant 0 : i32
    return %c0_i32, %c0_i32_0 : i32, i32
  }
  func.func @transform_5(%arg0: i32) -> (i32, i32) {
    %c0_i32 = arith.constant 0 : i32
    %c0_i32_0 = arith.constant 0 : i32
    %c0_i32_1 = arith.constant 0 : i32
    return %c0_i32, %c0_i32_0 : i32, i32
  }
  func.func @transform_6(%arg0: i32) -> (i32, i32) {
    %c0_i32 = arith.constant 0 : i32
    %c0_i32_0 = arith.constant 0 : i32
    %c0_i32_1 = arith.constant 0 : i32
    return %c0_i32, %c0_i32_0 : i32, i32
  }
  func.func @transform_7(%arg0: i32) -> (i32, i32) {
    %c0_i32 = arith.constant 0 : i32
    %c0_i32_0 = arith.constant 0 : i32
    %c0_i32_1 = arith.constant 0 : i32
    return %c0_i32, %c0_i32_0 : i32, i32
  }
  func.func @transform_8(%arg0: i32) -> (i32, i32) {
    %c0_i32 = arith.constant 0 : i32
    %c0_i32_0 = arith.constant 0 : i32
    return %arg0, %c0_i32 : i32, i32
  }
}

</mosaic_0001>

<bundles_post_ra>
// kernel: image_embedding.1
= control target key start
LH: loop header
LB: loop body
LE: loop exit
PB: predicated region body
PF: predicated region fallthrough
CT: control target
= control target key end

     0   :  { %v601_v11 = vmov 0.0   ;;  %vm602_vm0 = vmmov 0   ;;  %s916_s0 = inlined_call_operand.vmem [shape: f32[40,128], index: 0, kind: input, shape index: {}]   ;;  %s917_s3 = inlined_call_operand.vmem [shape: bf16[128,128], index: 3, kind: input, shape index: {}]   ;;  %s918_s1 = inlined_call_operand.vmem [shape: f32[1,128], index: 1, kind: input, shape index: {}]   ;;  %s919_s2 = inlined_call_operand.vmem [shape: f32[1,128], index: 2, kind: input, shape index: {}]   ;;  %s920_s4 = inlined_call_operand.vmem [shape: f32[1,128], index: 4, kind: input, shape index: {}]   ;;  %s921_s5 = inlined_call_operand.vmem [shape: f32[1,128], index: 5, kind: input, shape index: {}]   ;;  %s922_s6 = inlined_call_operand.vmem [shape: f32[1,128], index: 6, kind: input, shape index: {}]   ;;  %s923_s7 = inlined_call_operand.vmem [shape: f32[1,128], index: 7, kind: input, shape index: {}]   ;;  %s924_s8 = inlined_call_operand.vmem [shape: f32[40,128], index: 8, kind: output, shape index: {}]  }
   0x1   :  { %v651_v0 = vld [vmem:[%s916_s0 + $0x10] sm:$0xff]  ;;  %v656_v1 = vld [vmem:[%s916_s0 + $0x18] sm:$0xff]  ;;  %v667_v4 = vld [vmem:[%s916_s0] sm:$0xff]  ;;  %545 = vmatprep.subr.bf16.mxu1 %v601_v11  ;;  %517 = vmatprep.subr.bf16.mxu0 %v601_v11 }
   0x2   :  { %39 = vadd.xlane.f32.xlu0 %v651_v0  ;;  %v52_v2 = vmul.f32 %v651_v0, %v651_v0  ;;  %v53_v3 = vmul.f32 %v656_v1, %v656_v1  ;;  %v672_v5 = vld [vmem:[%s916_s0 + $0x8] sm:$0xff]  ;;  %v678_v6 = vld [vmem:[%s916_s0 + $0x20] sm:$0xff]  ;;  %v50_v7 = vmul.f32 %v667_v4, %v667_v4  ;;  %v575_v13 = vld [vmem:[%s917_s3 + $0x10] sm:$0xff]   ;;  %537 = vmatprep.mubr.msk.bf16.mxu1 %vm602_vm0, %v601_v11 }
   0x3   :  { %v51_v8 = vmul.f32 %v672_v5, %v672_v5  ;;  %v54_v9 = vmul.f32 %v678_v6, %v678_v6  ;;  %v573_v10 = vld [vmem:[%s917_s3] sm:$0xff]   ;;  %v574_v12 = vld [vmem:[%s917_s3 + $0x8] sm:$0xff]   ;;  %v576_v14 = vld [vmem:[%s917_s3 + $0x18] sm:$0xff]   ;;  %533 = vmatprep.mubr.msk.bf16.mxu0 %vm602_vm0, %v601_v11 }
   0x4   :  { %59 = vadd.xlane.f32.xlu1 %v52_v2  ;;  %553 = vmatpush3.bf16.msra.mxu1 %v573_v10  ;;  %v577_v15 = vld [vmem:[%s917_s3 + $0x20] sm:$0xff]   ;;  %v578_v16 = vld [vmem:[%s917_s3 + $0x28] sm:$0xff]   ;;  %v579_v17 = vld [vmem:[%s917_s3 + $0x30] sm:$0xff]  }
   0x5   :  { %546 = vmatprep.subr.bf16.mxu1 %v601_v11  ;;  %518 = vmatpush3.bf16.msra.mxu0 %v573_v10  ;;  %v580_v18 = vld [vmem:[%s917_s3 + $0x38] sm:$0xff]   ;;  %v492_v61 = vld [vmem:[%s918_s1] ss:$0 sm:$0xff] }
   0x6   :  { %41 = vadd.xlane.f32.xlu0 %v656_v1  ;;  %519 = vmatprep.subr.bf16.mxu0 %v601_v11 }
   0x8   :  { %61 = vadd.xlane.f32.xlu1 %v53_v3  ;;  %554 = vmatpush3.bf16.msra.mxu1 %v574_v12 }
   0x9   :  { %547 = vmatprep.subr.bf16.mxu1 %v601_v11  ;;  %520 = vmatpush3.bf16.msra.mxu0 %v574_v12 }
   0xa   :  { %35 = vadd.xlane.f32.xlu0 %v667_v4  ;;  %521 = vmatprep.subr.bf16.mxu0 %v601_v11 }
   0xc   :  { %37 = vadd.xlane.f32.xlu1 %v672_v5  ;;  %555 = vmatpush3.bf16.msra.mxu1 %v575_v13 }
   0xd   :  { %548 = vmatprep.subr.bf16.mxu1 %v601_v11  ;;  %522 = vmatpush3.bf16.msra.mxu0 %v575_v13 }
   0xe   :  { %43 = vadd.xlane.f32.xlu0 %v678_v6  ;;  %523 = vmatprep.subr.bf16.mxu0 %v601_v11 }
  0x10   :  { %55 = vadd.xlane.f32.xlu1 %v50_v7  ;;  %556 = vmatpush3.bf16.msra.mxu1 %v576_v14 }
  0x11   :  { %549 = vmatprep.subr.bf16.mxu1 %v601_v11  ;;  %524 = vmatpush3.bf16.msra.mxu0 %v576_v14 }
  0x12   :  { %57 = vadd.xlane.f32.xlu0 %v51_v8  ;;  %525 = vmatprep.subr.bf16.mxu0 %v601_v11 }
  0x14   :  { %63 = vadd.xlane.f32.xlu1 %v54_v9  ;;  %557 = vmatpush3.bf16.msra.mxu1 %v577_v15 }
  0x15   :  { %550 = vmatprep.subr.bf16.mxu1 %v601_v11  ;;  %526 = vmatpush3.bf16.msra.mxu0 %v577_v15 }
  0x16   :  { %527 = vmatprep.subr.bf16.mxu0 %v601_v11 }
  0x18   :  { %558 = vmatpush3.bf16.msra.mxu1 %v578_v16 }
  0x19   :  { %551 = vmatprep.subr.bf16.mxu1 %v601_v11  ;;  %528 = vmatpush3.bf16.msra.mxu0 %v578_v16 }
  0x1a   :  { %529 = vmatprep.subr.bf16.mxu0 %v601_v11 }
  0x1c   :  { %559 = vmatpush3.bf16.msra.mxu1 %v579_v17 }
  0x1d   :  { %552 = vmatprep.subr.bf16.mxu1 %v601_v11  ;;  %530 = vmatpush3.bf16.msra.mxu0 %v579_v17 }
  0x1e   :  { %531 = vmatprep.subr.bf16.mxu0 %v601_v11 }
  0x20   :  { %560 = vmatpush3.bf16.msra.mxu1 %v580_v18 }
  0x21   :  { %532 = vmatpush3.bf16.msra.mxu0 %v580_v18 }
  0x8f   :  { %v40_v19 = vpop.xlane.xlu0 %39 }
  0x90   :  { %v47_v20 = vmul.f32 0.015625, %v40_v19 }
  0x91   :  { %v60_v21 = vpop.xlane.xlu1 %59 }
  0x92   :  { %v72_v22 = vmul.f32 %v47_v20, %v47_v20  ;;  %v67_v23 = vmul.f32 0.015625, %v60_v21  ;;  %v87_v53 = vsub.f32 %v651_v0, %v47_v20  ;;  %v493_v0 = vld [vmem:[%s919_s2] ss:$0 sm:$0xff] }
  0x93   :  { %v42_v24 = vpop.xlane.xlu0 %41 }
  0x94   :  { %v77_v25 = vsub.f32 %v67_v23, %v72_v22  ;;  %v48_v26 = vmul.f32 0.015625, %v42_v24 }
  0x95   :  { %v62_v27 = vpop.xlane.xlu1 %61 }
  0x96   :  { %v82_v28 = vmax.f32 %v77_v25, 0.0  ;;  %v73_v29 = vmul.f32 %v48_v26, %v48_v26  ;;  %v68_v30 = vmul.f32 0.015625, %v62_v27  ;;  %v88_v62 = vsub.f32 %v656_v1, %v48_v26 }
  0x97   :  { %v36_v31 = vpop.xlane.xlu0 %35 }
  0x98   :  { %v92_v32 = vadd.f32 1e-05, %v82_v28  ;;  %v78_v33 = vsub.f32 %v68_v30, %v73_v29  ;;  %v45_v36 = vmul.f32 0.015625, %v36_v31 }
  0x99   :  { %v38_v34 = vpop.xlane.xlu1 %37 }
  0x9a   :  { %581 = vrsqrt.f32 %v92_v32  ;;  %v83_v35 = vmax.f32 %v78_v33, 0.0  ;;  %v46_v39 = vmul.f32 0.015625, %v38_v34  ;;  %v70_v41 = vmul.f32 %v45_v36, %v45_v36 }
  0x9b   :  { %v44_v37 = vpop.xlane.xlu0 %43  ;;  %v85_v12 = vsub.f32 %v667_v4, %v45_v36 }
  0x9c   :  { %v93_v38 = vadd.f32 1e-05, %v83_v35  ;;  %v49_v42 = vmul.f32 0.015625, %v44_v37  ;;  %v71_v45 = vmul.f32 %v46_v39, %v46_v39  ;;  %v86_v15 = vsub.f32 %v672_v5, %v46_v39 }
  0x9d   :  { %v56_v40 = vpop.xlane.xlu1 %55 }
  0x9e   :  { %583 = vrsqrt.f32 %v93_v38  ;;  %v65_v43 = vmul.f32 0.015625, %v56_v40  ;;  %v74_v49 = vmul.f32 %v49_v42, %v49_v42  ;;  %v89_v17 = vsub.f32 %v678_v6, %v49_v42  ;;  %v494_v6 = vld [vmem:[%s920_s4] ss:$0 sm:$0xff] }
  0x9f   :  { %v58_v44 = vpop.xlane.xlu0 %57 }
  0xa0   :  { %v75_v46 = vsub.f32 %v65_v43, %v70_v41  ;;  %v66_v47 = vmul.f32 0.015625, %v58_v44 }
  0xa1   :  { %v64_v48 = vpop.xlane.xlu1 %63 }
  0xa2   :  { %v80_v50 = vmax.f32 %v75_v46, 0.0  ;;  %v76_v51 = vsub.f32 %v66_v47, %v71_v45  ;;  %v69_v52 = vmul.f32 0.015625, %v64_v48  ;;  %v354_v48 = vlaneseq }
  0xa4   :  { %v582_v54 = vpop.eup %581  ;;  %v90_v55 = vadd.f32 1e-05, %v80_v50  ;;  %v81_v56 = vmax.f32 %v76_v51, 0.0  ;;  %v79_v57 = vsub.f32 %v69_v52, %v74_v49  ;;  %v355_v49 = vshrl.u32 %v354_v48, 7 }
  0xa5   :  { %v102_v58 = vmul.f32 %v582_v54, %v87_v53 }
  0xa6   :  { %585 = vrsqrt.f32 %v90_v55  ;;  %v91_v59 = vadd.f32 1e-05, %v81_v56  ;;  %v84_v60 = vmax.f32 %v79_v57, 0.0  ;;  %v356_v50 = vadd.s32 8, %v355_v49 }
  0xa7   :  { %v114_v7 = vmul.f32 %v492_v61, %v102_v58  ;;  %v776_v55 = vmul.u32.u64.low 4042322161, %v355_v49  ;;  %v777_v56 = vmul.u32.u64.high 4042322161, %v355_v49, %v776_v55  ;;  %v779_v58 = vadd.s32 16, %v355_v49 }
  0xa8   :  { %v584_v63 = vpop.eup %583  ;;  %587 = vrsqrt.f32 %v91_v59  ;;  %v94_v2 = vadd.f32 1e-05, %v84_v60  ;;  %v773_v51 = vmul.u32.u64.low 4042322161, %v356_v50  ;;  %v774_v52 = vmul.u32.u64.high 4042322161, %v356_v50, %v773_v51 }
  0xa9   :  { %v103_v3 = vmul.f32 %v584_v63, %v88_v62  ;;  %v126_v9 = vadd.f32 %v493_v0, %v114_v7  ;;  %v781_v59 = vadd.s32 32, %v355_v49  ;;  %v785_v62 = vadd.s32 24, %v355_v49 }
  0xaa   :  { %589 = vrsqrt.f32 %v94_v2  ;;  %v383_v2 = vshrl.u32 %v774_v52, 4 }
  0xab   :  { %v115_v8 = vmul.f32 %v492_v61, %v103_v3 }
  0xad   :  { %v127_v10 = vadd.f32 %v493_v0, %v115_v8 }
  0xaf   :  { %v130_v13 = vpack.c.bf16 %v127_v10, %v126_v9  ;;  %v795_v8 = vmul.u32.u64.low 4042322161, %v781_v59  ;;  %v796_v9 = vmul.u32.u64.high 4042322161, %v781_v59, %v795_v8 }
  0xb0   :  { %v586_v14 = vpop.eup %585 }
  0xb1   :  { %538 = vmatmul.mubr.bf16.vlgmr.msra.gmra.mrb[0].mxu1 %v130_v13  ;;  %v100_v1 = vmul.f32 %v586_v14, %v85_v12  ;;  %v372_v13 = vshrl.u32 %v777_v56, 4 }
  0xb2   :  { %v588_v16 = vpop.eup %587  ;;  %541 = vmatprep.mubr.msk.bf16.mxu1 %vm602_vm0, %v601_v11 }
  0xb3   :  { %v101_v18 = vmul.f32 %v588_v16, %v86_v15  ;;  %v112_v19 = vmul.f32 %v492_v61, %v100_v1  ;;  %v802_v15 = vmul.u32.u64.low 4042322161, %v785_v62  ;;  %v803_v1 = vmul.u32.u64.high 4042322161, %v785_v62, %v802_v15 }
  0xb4   :  { %v590_v20 = vpop.eup %589 }
  0xb5   :  { %v113_v21 = vmul.f32 %v492_v61, %v101_v18  ;;  %v104_v22 = vmul.f32 %v590_v20, %v89_v17  ;;  %v124_v23 = vadd.f32 %v493_v0, %v112_v19  ;;  %v384_v17 = vmul.u32 17, %v383_v2 }
  0xb7   :  { %v125_v24 = vadd.f32 %v493_v0, %v113_v21  ;;  %v116_v4 = vmul.f32 %v492_v61, %v104_v22 }
  0xb9   :  { %v129_v25 = vpack.c.bf16 %v125_v24, %v124_v23  ;;  %v128_v26 = vadd.f32 %v493_v0, %v116_v4  ;;  %v791_v7 = vmul.u32.u64.low 4042322161, %v779_v58  ;;  %v792_v0 = vmul.u32.u64.high 4042322161, %v779_v58, %v791_v7 }
  0xba   :  { %v373_v4 = vmul.u32 17, %v372_v13 }
  0xbb   :  { %534 = vmatmul.mubr.bf16.vlgmr.msra.gmra.mrb[0].mxu0 %v129_v25  ;;  %v131_v5 = vpack.c.bf16 %v128_v26, %v128_v26  ;;  %v811_v26 = vsub.s32 %v356_v50, %v384_v17 }
  0xbd   :  { %542 = vmatmul.mubr.bf16.gmra.mrb[4].mxu1 %v131_v5  ;;  %vm422_vm1 = vcmp.ne.s32.totalorder %v811_v26, 0  ;;  %vm427_vm2 = vcmp.lt.s32.totalorder %v811_v26, 0  ;;  %v437_v52 = vadd.s32 17, %v811_v26 }
  0xbe   :  { %vm833_vm5 = vmand %vm427_vm2, %vm422_vm1 }
 0x184   :  { %v245_v27 = vpop.f32.mrb[0].mxu1 }
 0x185   :  { %v539_v28 = vpop.f32.mrb[1].mxu1  ;;  %v753_v39 = vadd.f32 %v494_v6, %v245_v27 }
 0x186   :  { %v248_v29 = vpop.f32.mrb[2].mxu1 }
 0x187   :  { %v540_v30 = vpop.f32.mrb[3].mxu1  ;;  %v756_v41 = vadd.f32 %v494_v6, %v248_v29  ;;  %v276_v45 = vmul.f32 %v753_v39, %v753_v39 }
 0x188   :  { %v394_v30 = vshrl.u32 %v792_v0, 4 }
 0x189   :  { %v277_v46 = vmul.f32 %v756_v41, %v756_v41 }
 0x18e   :  { %v237_v11 = vpop.f32.mrb[0].mxu0 }
 0x18f   :  { %v748_v31 = vadd.f32 %v494_v6, %v237_v11  ;;  %v535_v32 = vpop.f32.mrb[1].mxu0 }
 0x190   :  { %v240_v33 = vpop.f32.mrb[2].mxu0  ;;  %v253_v34 = vpop.f32.mrb[4].mxu1  ;;  %v416_v32 = vshrl.u32 %v796_v9, 4 }
 0x191   :  { %v750_v35 = vadd.f32 %v494_v6, %v240_v33  ;;  %259 = vadd.xlane.f32.xlu0 %v748_v31  ;;  %v536_v36 = vpop.f32.mrb[3].mxu0  ;;  %v543_v37 = vpop.f32.mrb[5].mxu1  ;;  %v274_v43 = vmul.f32 %v748_v31, %v748_v31  ;;  %v764_v44 = vadd.f32 %v494_v6, %v253_v34 }
 0x192   :  { %v256_v38 = vpop.f32.mrb[6].mxu1  ;;  %v821_v37 = vsub.s32 %v355_v49, %v373_v4  ;;  %v417_v51 = vmul.u32 17, %v416_v32 }
 0x193   :  { %261 = vadd.xlane.f32.xlu1 %v750_v35  ;;  %v544_v40 = vpop.f32.mrb[7].mxu1  ;;  %v275_v42 = vmul.f32 %v750_v35, %v750_v35  ;;  %v278_v47 = vmul.f32 %v764_v44, %v764_v44 }
 0x194   :  { %v405_v40 = vshrl.u32 %v803_v1, 4  ;;  %vm421_vm3 = vcmp.ne.s32.totalorder %v821_v37, 0  ;;  %vm426_vm4 = vcmp.lt.s32.totalorder %v821_v37, 0  ;;  %v436_v2 = vadd.s32 17, %v821_v37 }
 0x195   :  { %263 = vadd.xlane.f32.xlu0 %v753_v39  ;;  %vm842_vm6 = vmand %vm426_vm4, %vm421_vm3  ;;  %vm455_vm4 = vcmp.lt.s32.totalorder %v781_v59, 34 }
 0x197   :  { %265 = vadd.xlane.f32.xlu1 %v756_v41 }
 0x199   :  { %281 = vadd.xlane.f32.xlu0 %v275_v42 }
 0x19b   :  { %279 = vadd.xlane.f32.xlu1 %v274_v43 }
 0x19d   :  { %267 = vadd.xlane.f32.xlu0 %v764_v44 }
 0x19f   :  { %283 = vadd.xlane.f32.xlu1 %v276_v45 }
 0x1a1   :  { %285 = vadd.xlane.f32.xlu0 %v277_v46 }
 0x1a3   :  { %287 = vadd.xlane.f32.xlu1 %v278_v47  ;;  %v395_v47 = vmul.u32 17, %v394_v30 }
 0x21e   :  { %v260_v53 = vpop.xlane.xlu0 %259 }
 0x21f   :  { %v787_v63 = vmul.f32 0.03125, %v260_v53 }
 0x220   :  { %v262_v54 = vpop.xlane.xlu1 %261 }
 0x221   :  { %v783_v60 = vmul.f32 0.03125, %v262_v54  ;;  %v294_v16 = vmul.f32 %v787_v63, %v787_v63  ;;  %v406_v54 = vmul.u32 17, %v405_v40  ;;  %v309_v13 = vsub.f32 %v748_v31, %v787_v63  ;;  %v505_v63 = vld [vmem:[%s923_s7] ss:$0 sm:$0xff] }
 0x222   :  { %v264_v57 = vpop.xlane.xlu0 %263 }
 0x223   :  { %v295_v10 = vmul.f32 %v783_v60, %v783_v60  ;;  %v807_v20 = vmul.f32 0.03125, %v264_v57  ;;  %v310_v0 = vsub.f32 %v750_v35, %v783_v60  ;;  %v407_v9 = vsub.s32 %v785_v62, %v406_v54  ;;  %v504_v62 = vld [vmem:[%s922_s6] ss:$0 sm:$0xff] }
 0x224   :  { %v266_v61 = vpop.xlane.xlu1 %265 }
 0x225   :  { %v809_v22 = vmul.f32 0.03125, %v266_v61  ;;  %v296_v29 = vmul.f32 %v807_v20, %v807_v20  ;;  %v396_v61 = vsub.s32 %v779_v58, %v395_v47  ;;  %v503_v58 = vld [vmem:[%s921_s5] ss:$0 sm:$0xff]  ;;  %vm424_vm11 = vcmp.ne.s32.totalorder %v407_v9, 0 }
 0x226   :  { %v282_v3 = vpop.xlane.xlu0 %281  ;;  %vm429_vm12 = vcmp.lt.s32.totalorder %v407_v9, 0  ;;  %v311_v4 = vsub.f32 %v753_v39, %v807_v20 }
 0x227   :  { %v290_v12 = vmul.f32 0.03125, %v282_v3  ;;  %v297_v33 = vmul.f32 %v809_v22, %v809_v22  ;;  %v418_v3 = vsub.s32 %v781_v59, %v417_v51  ;;  %vm423_vm7 = vcmp.ne.s32.totalorder %v396_v61, 0  ;;  %vm882_vm1 = vmand %vm429_vm12, %vm424_vm11 }
 0x228   :  { %v280_v14 = vpop.xlane.xlu1 %279  ;;  %vm428_vm8 = vcmp.lt.s32.totalorder %v396_v61, 0  ;;  %v438_v15 = vadd.s32 17, %v396_v61 }
 0x229   :  { %v300_v18 = vsub.f32 %v290_v12, %v295_v10  ;;  %v289_v19 = vmul.f32 0.03125, %v280_v14  ;;  %v442_v12 = vsel %vm833_vm5, %v437_v52, %v811_v26  ;;  %v441_v14 = vsel %vm842_vm6, %v436_v2, %v821_v37  ;;  %vm868_vm14 = vmand %vm428_vm8, %vm423_vm7 }
 0x22a   :  { %v268_v21 = vpop.xlane.xlu0 %267  ;;  %vm425_vm9 = vcmp.ne.s32.totalorder %v418_v3, 0  ;;  %vm430_vm10 = vcmp.lt.s32.totalorder %v418_v3, 0  ;;  %vm861_vm13 = vcmp.eq.s32.totalorder %v442_v12, 0  ;;  %vm878_vm0 = vcmp.eq.s32.totalorder %v441_v14, 0 }
 0x22b   :  { %v305_v23 = vmax.f32 %v300_v18, 0.0  ;;  %v299_v24 = vsub.f32 %v289_v19, %v294_v16  ;;  %v813_v28 = vmul.f32 0.03125, %v268_v21  ;;  %v440_v18 = vadd.s32 17, %v418_v3  ;;  %vm872_vm15 = vmand %vm430_vm10, %vm425_vm9 }
 0x22c   :  { %v284_v25 = vpop.xlane.xlu1 %283 }
 0x22d   :  { %v315_v5 = vadd.f32 1e-05, %v305_v23  ;;  %v304_v27 = vmax.f32 %v299_v24, 0.0  ;;  %v291_v6 = vmul.f32 0.03125, %v284_v25  ;;  %v298_v43 = vmul.f32 %v813_v28, %v813_v28 }
 0x22e   :  { %v286_v11 = vpop.xlane.xlu0 %285  ;;  %v439_v23 = vadd.s32 17, %v407_v9 }
 0x22f   :  { %591 = vrsqrt.f32 %v315_v5  ;;  %v314_v34 = vadd.f32 1e-05, %v304_v27  ;;  %v292_v36 = vmul.f32 0.03125, %v286_v11  ;;  %v301_v38 = vsub.f32 %v291_v6, %v296_v29 }
 0x230   :  { %v288_v42 = vpop.xlane.xlu1 %287  ;;  %v312_v27 = vsub.f32 %v756_v41, %v809_v22  ;;  %v443_v6 = vsel %vm868_vm14, %v438_v15, %v396_v61  ;;  %v445_v11 = vsel %vm872_vm15, %v440_v18, %v418_v3  ;;  %v313_v41 = vsub.f32 %v764_v44, %v813_v28 }
 0x231   :  { %593 = vrsqrt.f32 %v314_v34  ;;  %v302_v45 = vsub.f32 %v292_v36, %v297_v33  ;;  %v293_v46 = vmul.f32 0.03125, %v288_v42  ;;  %v306_v48 = vmax.f32 %v301_v38, 0.0 }
 0x232   :  { %v444_v22 = vsel %vm882_vm1, %v439_v23, %v407_v9  ;;  %vm448_vm2 = vcmp.eq.s32.totalorder %v443_v6, 0  ;;  %vm450_vm3 = vcmp.eq.s32.totalorder %v445_v11, 0 }
 0x233   :  { %v307_v50 = vmax.f32 %v302_v45, 0.0  ;;  %v303_v49 = vsub.f32 %v293_v46, %v298_v43  ;;  %v316_v53 = vadd.f32 1e-05, %v306_v48  ;;  %vm449_vm5 = vcmp.eq.s32.totalorder %v444_v22, 0  ;;  %vm460_vm6 = vmand %vm450_vm3, %vm455_vm4 }
 0x235   :  { %v317_v55 = vadd.f32 1e-05, %v307_v50  ;;  %v308_v56 = vmax.f32 %v303_v49, 0.0  ;;  %595 = vrsqrt.f32 %v316_v53 }
 0x237   :  { %597 = vrsqrt.f32 %v317_v55  ;;  %v318_v7 = vadd.f32 1e-05, %v308_v56 }
 0x239   :  { %v592_v10 = vpop.eup %591  ;;  %599 = vrsqrt.f32 %v318_v7 }
 0x23a   :  { %v325_v35 = vmul.f32 %v592_v10, %v310_v0 }
 0x23b   :  { %v594_v60 = vpop.eup %593 }
 0x23c   :  { %v337_v1 = vmul.f32 %v503_v58, %v325_v35  ;;  %v324_v16 = vmul.f32 %v594_v60, %v309_v13 }
 0x23e   :  { %v349_v19 = vadd.f32 %v504_v62, %v337_v1  ;;  %v336_v21 = vmul.f32 %v503_v58, %v324_v16 }
 0x23f   :  { %v596_v5 = vpop.eup %595 }
 0x240   :  { %v479_v29 = vsel %vm861_vm13, %v505_v63, %v349_v19  ;;  %v348_v30 = vadd.f32 %v504_v62, %v336_v21  ;;  %v326_v20 = vmul.f32 %v596_v5, %v311_v4 }
 0x241   :  { %v598_v39 = vpop.eup %597  ;;  %484 = vst [vmem:[%s924_s8 + $0x8] sm:$0xff] %v479_v29 }
 0x242   :  { %v478_v32 = vsel %vm878_vm0, %v505_v63, %v348_v30  ;;  %v327_v33 = vmul.f32 %v598_v39, %v312_v27  ;;  %v338_v36 = vmul.f32 %v503_v58, %v326_v20 }
 0x243   :  { %v600_v34 = vpop.eup %599  ;;  %483 = vst [vmem:[%s924_s8] sm:$0xff] %v478_v32 }
 0x244   :  { %v339_v37 = vmul.f32 %v503_v58, %v327_v33  ;;  %v328_v38 = vmul.f32 %v600_v34, %v313_v41  ;;  %v350_v40 = vadd.f32 %v504_v62, %v338_v36 }
 0x246   :  { %v351_v42 = vadd.f32 %v504_v62, %v339_v37  ;;  %v340_v44 = vmul.f32 %v503_v58, %v328_v38  ;;  %v480_v28 = vsel %vm448_vm2, %v505_v63, %v350_v40 }
 0x247   :  { %485 = vst [vmem:[%s924_s8 + $0x10] sm:$0xff] %v480_v28 }
 0x248   :  { %v481_v43 = vsel %vm449_vm5, %v505_v63, %v351_v42  ;;  %v352_v45 = vadd.f32 %v504_v62, %v340_v44 }
 0x249   :  { %486 = vst [vmem:[%s924_s8 + $0x18] sm:$0xff] %v481_v43 }
 0x24a   :  { %v482_v46 = vsel %vm460_vm6, %v505_v63, %v352_v45 }
 0x24b   :  { %487 = vst [vmem:[%s924_s8 + $0x20] sm:$0xff] %v482_v46 }

</bundles_post_ra>
